<compile_context>
chip_gen: v7x
topology: tpu7x:2x2x1
jax: 0.10.0
libtpu: 0.0.40
codegen_flags: <defaults>
</compile_context>

<pallas_src>
import functools

import jax
import jax.numpy as jnp
from jax.experimental import pallas as pl
from jax.experimental.pallas import tpu as pltpu

HIDDEN = 30        # logical hidden width of the PyTorch module
HIDDEN_PAD = 128   # lane-aligned padded hidden width


def _round_up(x, m):
    return (x + m - 1) // m * m


def critic_kernel(s_ref, a_ref, ws_ref, wa_ref, bh_ref, wo_ref, bo_ref, out_ref):
    """One batch tile (all f32).

    s_ref : (TB, S)           state rows
    a_ref : (TB, A)           action rows
    ws_ref: (S, HIDDEN_PAD)   state-proj weight, hidden zero-padded 30 -> 128
    wa_ref: (A, HIDDEN_PAD)   action-proj weight, hidden zero-padded
    bh_ref: (1, HIDDEN_PAD)   bs + ba, zero-padded
    wo_ref: (HIDDEN_PAD, 1)   output-layer weight column, zero-padded
    bo_ref: (1,) in SMEM      output-layer bias scalar
    out_ref: (TB, 1)          critic value per row
    """
    # Fused input projections: two small-K MXU matmuls, f32 accumulation.
    h = (jnp.dot(s_ref[...], ws_ref[...], preferred_element_type=jnp.float32)
         + jnp.dot(a_ref[...], wa_ref[...], preferred_element_type=jnp.float32)
         + bh_ref[...])
    net = jnp.maximum(h, 0.0)                                   # (TB, HIDDEN_PAD)
    # Output layer on the MXU (N=1 matmul: same push count as the projections,
    # result already (TB, 1) -> no cross-lane reduce / relayout needed).
    out_ref[...] = (jnp.dot(net, wo_ref[...], preferred_element_type=jnp.float32)
                    + bo_ref[0])


def prepare_params(ws, bs, wa, ba, wo, bo):
    """Fold the three Linear layers into the kernel layout (done once).

    ws: (S, 30), bs: (30,), wa: (A, 30), ba: (30,), wo: (30, 1), bo: (1,)
    (weights stored as (in, out), i.e. transposed PyTorch layout)
    """
    pad = HIDDEN_PAD - HIDDEN
    ws_p = jnp.pad(ws, ((0, 0), (0, pad))).astype(jnp.float32)        # (S, 128)
    wa_p = jnp.pad(wa, ((0, 0), (0, pad))).astype(jnp.float32)        # (A, 128)
    bh = jnp.pad((bs + ba)[None, :], ((0, 0), (0, pad)))              # (1, 128)
    wo_p = jnp.pad(wo, ((0, pad), (0, 0))).astype(jnp.float32)        # (128, 1)
    bo_1 = bo.reshape(1).astype(jnp.float32)                          # (1,) SMEM
    return ws_p, wa_p, bh.astype(jnp.float32), wo_p, bo_1


@functools.partial(jax.jit, static_argnames=("block_b",))
def critic_forward(s, a, fused_params, *, block_b=8192):
    """s: (B, states_len) f32, a: (B, actions_len) f32 -> (B, 1) f32."""
    ws_p, wa_p, bh, wo_p, bo = fused_params
    B, S = s.shape
    A = a.shape[1]

    if B < 256:
        # Single (partial) tile; sublane-aligned.
        tb = _round_up(max(B, 1), 8)
    else:
        # >= 2 tiles so dimension_semantics=('parallel',) shards across both
        # TensorCores on v7x (free on v5e/v6e); 128-aligned, capped at block_b
        # which is sized so the (tb,128) f32 intermediates + double-buffered
        # input tiles stay well under the 32 MiB scoped-VMEM limit below.
        tb = min(_round_up(block_b, 128), _round_up(pl.cdiv(B, 2), 128))

    grid = (pl.cdiv(B, tb),)   # Pallas masks the partial last block

    return pl.pallas_call(
        critic_kernel,
        out_shape=jax.ShapeDtypeStruct((B, 1), jnp.float32),
        grid=grid,
        in_specs=[
            pl.BlockSpec((tb, S), lambda i: (i, 0)),        # state batch tile
            pl.BlockSpec((tb, A), lambda i: (i, 0)),        # action batch tile
            pl.BlockSpec(ws_p.shape, lambda i: (0, 0)),     # grid-invariant
            pl.BlockSpec(wa_p.shape, lambda i: (0, 0)),
            pl.BlockSpec(bh.shape, lambda i: (0, 0)),
            pl.BlockSpec(wo_p.shape, lambda i: (0, 0)),
            pl.BlockSpec(memory_space=pltpu.MemorySpace.SMEM),  # bo scalar
        ],
        out_specs=pl.BlockSpec((tb, 1), lambda i: (i, 0)),
        compiler_params=pltpu.CompilerParams(
            dimension_semantics=("parallel",),
            vmem_limit_bytes=32 * 1024 * 1024),
    )(s, a, ws_p, wa_p, bh, wo_p, bo)


def init_params(key, states_len, actions_len, hidden=HIDDEN):
    """Deterministic PyTorch-style init: U(-1/sqrt(fan_in), 1/sqrt(fan_in))."""
    ks = jax.random.split(key, 6)

    def lin(kw, kb, fan_in, fan_out):
        bound = 1.0 / jnp.sqrt(jnp.float32(fan_in))
        # weight stored as (in, out) so forward is x @ W
        w = jax.random.uniform(kw, (fan_in, fan_out), jnp.float32, -bound, bound)
        b = jax.random.uniform(kb, (fan_out,), jnp.float32, -bound, bound)
        return w, b

    ws, bs = lin(ks[0], ks[1], states_len, hidden)
    wa, ba = lin(ks[2], ks[3], actions_len, hidden)
    wo, bo = lin(ks[4], ks[5], hidden, 1)
    return ws, bs, wa, ba, wo, bo


def reference(s, a, raw_params):
    """Pure-JAX f32 reference mirroring the PyTorch Critic forward."""
    ws, bs, wa, ba, wo, bo = raw_params
    net = jnp.maximum(s @ ws + bs + a @ wa + ba, 0.0)
    return net @ wo + bo


if __name__ == "__main__":
    key = jax.random.PRNGKey(0)
    k_s, k_a, k_p, k_s2, k_a2 = jax.random.split(key, 5)

    states_len = 16   # env.observation_space.shape[0] (synthetic)
    actions_len = 4   # env.action_space.shape[0] (synthetic)

    raw = init_params(k_p, states_len, actions_len)
    fused = prepare_params(*raw)

    # --- test 1: tiny batch (single partial tile, 2 rows in an 8-row block) --
    B1 = 2
    s1 = jax.random.normal(k_s, (B1, states_len), jnp.float32)
    a1 = jax.random.normal(k_a, (B1, actions_len), jnp.float32)
    v1 = jax.block_until_ready(critic_forward(s1, a1, fused))
    r1 = reference(s1, a1, raw)
    assert v1.shape == (B1, 1)
    assert jnp.allclose(v1, r1, atol=1e-3, rtol=1e-3), "mismatch (B=2)"

    # --- test 2: multi-tile grid (300 rows -> 2 tiles of 256, partial last) --
    B2 = 300
    s2 = jax.random.normal(k_s2, (B2, states_len), jnp.float32)
    a2 = jax.random.normal(k_a2, (B2, actions_len), jnp.float32)
    v2 = jax.block_until_ready(critic_forward(s2, a2, fused))
    r2 = reference(s2, a2, raw)
    assert v2.shape == (B2, 1)
    assert jnp.allclose(v2, r2, atol=1e-3, rtol=1e-3), "mismatch (B=300)"

    print("KERNEL_OK")
</pallas_src>

<mosaic_0001>
module attributes {stable_mosaic.version = 11 : i64} {
  func.func @critic_kernel(%arg0: i32, %arg1: memref<8x16xf32, #tpu.memory_space<vmem>>, %arg2: memref<8x4xf32, #tpu.memory_space<vmem>>, %arg3: memref<16x128xf32, #tpu.memory_space<vmem>>, %arg4: memref<4x128xf32, #tpu.memory_space<vmem>>, %arg5: memref<1x128xf32, #tpu.memory_space<vmem>>, %arg6: memref<128x1xf32, #tpu.memory_space<vmem>>, %arg7: memref<1xf32, #tpu.memory_space<smem>>, %arg8: memref<8x1xf32, #tpu.memory_space<vmem>>) attributes {dimension_semantics = [#tpu.dimension_semantics<parallel>], iteration_bounds = array<i64: 1>, scalar_prefetch = 0 : i64, scratch_operands = 0 : i64, tpu.core_type = #tpu.core_type<tc>, window_params = [{transform_indices = @transform_0, window_bounds = array<i64: 8, 16>}, {transform_indices = @transform_1, window_bounds = array<i64: 8, 4>}, {pipeline_mode = #tpu.pipeline_mode<synchronous>, transform_indices = @transform_2, window_bounds = array<i64: 16, 128>}, {pipeline_mode = #tpu.pipeline_mode<synchronous>, transform_indices = @transform_3, window_bounds = array<i64: 4, 128>}, {pipeline_mode = #tpu.pipeline_mode<synchronous>, transform_indices = @transform_4, window_bounds = array<i64: 1, 128>}, {pipeline_mode = #tpu.pipeline_mode<synchronous>, transform_indices = @transform_5, window_bounds = array<i64: 128, 1>}, {transform_indices = @transform_6, window_bounds = array<i64: 1>}, {transform_indices = @transform_7, window_bounds = array<i64: 8, 1>}]} {
    %c0 = arith.constant 0 : index
    %c0_0 = arith.constant 0 : index
    %0 = vector.load %arg1[%c0, %c0_0] : memref<8x16xf32, #tpu.memory_space<vmem>>, vector<8x16xf32>
    %c0_1 = arith.constant 0 : index
    %c0_2 = arith.constant 0 : index
    %1 = vector.load %arg3[%c0_1, %c0_2] : memref<16x128xf32, #tpu.memory_space<vmem>>, vector<16x128xf32>
    %cst = arith.constant dense<0.000000e+00> : vector<8x128xf32>
    %2 = tpu.matmul %0, %1, %cst {dimension_numbers = #tpu.dot_dimension_numbers<[1], [0], [0], [1], [0, 0, 1, 1], [], []>} : vector<8x16xf32>, vector<16x128xf32>, vector<8x128xf32> -> vector<8x128xf32>
    %c0_3 = arith.constant 0 : index
    %c0_4 = arith.constant 0 : index
    %3 = vector.load %arg2[%c0_3, %c0_4] : memref<8x4xf32, #tpu.memory_space<vmem>>, vector<8x4xf32>
    %c0_5 = arith.constant 0 : index
    %c0_6 = arith.constant 0 : index
    %4 = vector.load %arg4[%c0_5, %c0_6] : memref<4x128xf32, #tpu.memory_space<vmem>>, vector<4x128xf32>
    %cst_7 = arith.constant dense<0.000000e+00> : vector<8x128xf32>
    %5 = tpu.matmul %3, %4, %cst_7 {dimension_numbers = #tpu.dot_dimension_numbers<[1], [0], [0], [1], [0, 0, 1, 1], [], []>} : vector<8x4xf32>, vector<4x128xf32>, vector<8x128xf32> -> vector<8x128xf32>
    %6 = arith.addf %2, %5 : vector<8x128xf32>
    %c0_8 = arith.constant 0 : index
    %c0_9 = arith.constant 0 : index
    %7 = vector.load %arg5[%c0_8, %c0_9] : memref<1x128xf32, #tpu.memory_space<vmem>>, vector<1x128xf32>
    %8 = vector.broadcast %7 : vector<1x128xf32> to vector<8x128xf32>
    %9 = arith.addf %6, %8 : vector<8x128xf32>
    %cst_10 = arith.constant 0.000000e+00 : f32
    %10 = vector.broadcast %cst_10 : f32 to vector<8x128xf32>
    %11 = arith.maximumf %9, %10 : vector<8x128xf32>
    %c0_11 = arith.constant 0 : index
    %c0_12 = arith.constant 0 : index
    %12 = vector.load %arg6[%c0_11, %c0_12] : memref<128x1xf32, #tpu.memory_space<vmem>>, vector<128x1xf32>
    %cst_13 = arith.constant dense<0.000000e+00> : vector<8x1xf32>
    %13 = tpu.matmul %11, %12, %cst_13 {dimension_numbers = #tpu.dot_dimension_numbers<[1], [0], [0], [1], [0, 0, 1, 1], [], []>} : vector<8x128xf32>, vector<128x1xf32>, vector<8x1xf32> -> vector<8x1xf32>
    %c0_14 = arith.constant 0 : index
    %14 = memref.load %arg7[%c0_14] : memref<1xf32, #tpu.memory_space<smem>>
    %15 = vector.broadcast %14 : f32 to vector<8x1xf32>
    %16 = arith.addf %13, %15 : vector<8x1xf32>
    %c0_15 = arith.constant 0 : index
    %c0_16 = arith.constant 0 : index
    %17 = vector.load %arg8[%c0_15, %c0_16] : memref<8x1xf32, #tpu.memory_space<vmem>>, vector<8x1xf32>
    tpu.vector_store %arg8[%c0_15, %c0_16], %16 {strides = array<i32>} : memref<8x1xf32, #tpu.memory_space<vmem>>, vector<8x1xf32>,
    return
  }
  func.func @transform_0(%arg0: i32) -> (i32, i32) {
    %c0_i32 = arith.constant 0 : i32
    %c0_i32_0 = arith.constant 0 : i32
    return %arg0, %c0_i32 : i32, i32
  }
  func.func @transform_1(%arg0: i32) -> (i32, i32) {
    %c0_i32 = arith.constant 0 : i32
    %c0_i32_0 = arith.constant 0 : i32
    return %arg0, %c0_i32 : i32, i32
  }
  func.func @transform_2(%arg0: i32) -> (i32, i32) {
    %c0_i32 = arith.constant 0 : i32
    %c0_i32_0 = arith.constant 0 : i32
    %c0_i32_1 = arith.constant 0 : i32
    return %c0_i32, %c0_i32_0 : i32, i32
  }
  func.func @transform_3(%arg0: i32) -> (i32, i32) {
    %c0_i32 = arith.constant 0 : i32
    %c0_i32_0 = arith.constant 0 : i32
    %c0_i32_1 = arith.constant 0 : i32
    return %c0_i32, %c0_i32_0 : i32, i32
  }
  func.func @transform_4(%arg0: i32) -> (i32, i32) {
    %c0_i32 = arith.constant 0 : i32
    %c0_i32_0 = arith.constant 0 : i32
    %c0_i32_1 = arith.constant 0 : i32
    return %c0_i32, %c0_i32_0 : i32, i32
  }
  func.func @transform_5(%arg0: i32) -> (i32, i32) {
    %c0_i32 = arith.constant 0 : i32
    %c0_i32_0 = arith.constant 0 : i32
    %c0_i32_1 = arith.constant 0 : i32
    return %c0_i32, %c0_i32_0 : i32, i32
  }
  func.func @transform_6(%arg0: i32) -> i32 {
    %c0_i32 = arith.constant 0 : i32
    %c0_i32_0 = arith.constant 0 : i32
    return %c0_i32 : i32
  }
  func.func @transform_7(%arg0: i32) -> (i32, i32) {
    %c0_i32 = arith.constant 0 : i32
    %c0_i32_0 = arith.constant 0 : i32
    return %arg0, %c0_i32 : i32, i32
  }
}

</mosaic_0001>

<bundles_post_ra>
// kernel: critic_forward.1
= control target key start
LH: loop header
LB: loop body
LE: loop exit
PB: predicated region body
PF: predicated region fallthrough
CT: control target
= control target key end

     0   :  { %vm36_vm0 = vcmask 1043456   ;;  %v425_v2 = vmov 0.0   ;;  %vm426_vm1 = vmmov 0   ;;  %vm32_vm2 = vcmask 31744   ;;  %s543_s0 = inlined_call_operand.vmem [shape: f32[2,16], index: 0, kind: input, shape index: {}]   ;;  %s544_s1 = inlined_call_operand.vmem [shape: f32[2,4], index: 1, kind: input, shape index: {}]   ;;  %s545_s2 = inlined_call_operand.vmem [shape: f32[16,128], index: 2, kind: input, shape index: {}]   ;;  %s546_s3 = inlined_call_operand.vmem [shape: f32[4,128], index: 3, kind: input, shape index: {}]   ;;  %s547_s4 = inlined_call_operand.vmem [shape: f32[1,128], index: 4, kind: input, shape index: {}]   ;;  %s548_s5 = inlined_call_operand.vmem [shape: f32[128,1], index: 5, kind: input, shape index: {}]   ;;  %s549_s6 = inlined_call_operand.<no memory space> [shape: f32[1], index: 6, kind: input, shape index: {}]   ;;  %s550_s7 = inlined_call_operand.vmem [shape: f32[2,1], index: 7, kind: output, shape index: {}]  }
   0x1   :  { %v31_v0 = vld [vmem:[%s546_s3] sm:$0xf]  ;;  %348 = vmatprep.subr.mxu1 %v425_v2  ;;  %350 = vmatprep.mubr.msk.f32.mxu1 %vm426_vm1, %v425_v2  ;;  %v29_v4 = vld [vmem:[%s545_s2 + $0x8] sm:$0xff]  ;;  %v427_v6 = vmov 0.0|0.0   ;;  %v195_v9 = vld [vmem:[%s548_s5 + $0x10] sm:$0xff]  ;;  %vm110_vm3 = vcmask 130048   ;;  %v210_v40 = vstv %s549_s6 }
   0x2   :  { %v30_v1 = vld [vmem:[%s544_s1] sm:$0xff]  ;;  %349 = vmatpush3.msk.msra.mxu1 %vm36_vm0, %v31_v0  ;;  %398 = vmatprep.subr.bf16.mxu0 %v427_v6  ;;  %v194_v8 = vld [vmem:[%s548_s5 + $0x8] sm:$0xff]  ;;  %v196_v11 = vld [vmem:[%s548_s5 + $0x18] sm:$0xff]  ;;  %vm281_vm4 = vcmask 7168  }
   0x3   :  { %v28_v3 = vld [vmem:[%s545_s2] sm:$0xff]  ;;  %351 = vmatmul.mubr.msk.f32.vlgmr.msra.gmra.mrb[0].mxu1 %vm32_vm2, %v30_v1  ;;  %395 = vmatprep.subr.bf16.mxu1 %v427_v6  ;;  %v402_v13 = vpack.c.bf16 %v196_v11, %v195_v9  ;;  %v198_v15 = vld [vmem:[%s548_s5 + $0x28] sm:$0xff]  ;;  %v199_v17 = vld [vmem:[%s548_s5 + $0x30] sm:$0xff] }
   0x4   :  { %v396_v5 = vpack.c.bf16 %v29_v4, %v28_v3  ;;  %v193_v7 = vld [vmem:[%s548_s5] sm:$0xff]  ;;  %357 = vmatprep.mubr.msk.f32.mxu1 %vm426_vm1, %v425_v2  ;;  %392 = vmatprep.mubr.msk.f32.mxu0 %vm426_vm1, %v425_v2  ;;  %v200_v18 = vld [vmem:[%s548_s5 + $0x38] sm:$0xff]  ;;  %v202_v21 = vld [vmem:[%s548_s5 + $0x48] sm:$0xff] }
   0x5   :  { %v399_v10 = vpack.c.bf16 %v194_v8, %v193_v7  ;;  %v27_v12 = vld [vmem:[%s543_s0] sm:$0xff]  ;;  %v408_v19 = vpack.c.bf16 %v200_v18, %v199_v17  ;;  %v203_v23 = vld [vmem:[%s548_s5 + $0x50] sm:$0xff]  ;;  %v204_v24 = vld [vmem:[%s548_s5 + $0x58] sm:$0xff] }
   0x6   :  { %397 = vmatpush3.bf16.msra.mxu1 %v396_v5  ;;  %v197_v14 = vld [vmem:[%s548_s5 + $0x20] sm:$0xff]  ;;  %v414_v25 = vpack.c.bf16 %v204_v24, %v203_v23  ;;  %v206_v27 = vld [vmem:[%s548_s5 + $0x68] sm:$0xff]  ;;  %v207_v29 = vld [vmem:[%s548_s5 + $0x70] sm:$0xff] }
   0x7   :  { %400 = vmatpush3.bf16.msra.mxu0 %v399_v10  ;;  %v405_v16 = vpack.c.bf16 %v198_v15, %v197_v14  ;;  %v201_v20 = vld [vmem:[%s548_s5 + $0x40] sm:$0xff]  ;;  %v208_v30 = vld [vmem:[%s548_s5 + $0x78] sm:$0xff] }
   0x8   :  { %401 = vmatprep.subr.bf16.mxu0 %v427_v6  ;;  %v411_v22 = vpack.c.bf16 %v202_v21, %v201_v20  ;;  %v205_v26 = vld [vmem:[%s548_s5 + $0x60] sm:$0xff]  ;;  %v420_v31 = vpack.c.bf16 %v208_v30, %v207_v29 }
   0x9   :  { %358 = vmatmul.mubr.msk.f32.vlgmr.msra.gmra.mrb[2].mxu1 %vm110_vm3, %v27_v12  ;;  %v417_v28 = vpack.c.bf16 %v206_v27, %v205_v26  ;;  %v325_v35 = vld [vmem:[%s547_s4] ss:$0 sm:$0xff] }
   0xb   :  { %403 = vmatpush3.bf16.msra.mxu0 %v402_v13 }
   0xc   :  { %404 = vmatprep.subr.bf16.mxu0 %v427_v6 }
   0xf   :  { %406 = vmatpush3.bf16.msra.mxu0 %v405_v16 }
  0x10   :  { %407 = vmatprep.subr.bf16.mxu0 %v427_v6 }
  0x13   :  { %409 = vmatpush3.bf16.msra.mxu0 %v408_v19 }
  0x14   :  { %410 = vmatprep.subr.bf16.mxu0 %v427_v6 }
  0x17   :  { %412 = vmatpush3.bf16.msra.mxu0 %v411_v22 }
  0x18   :  { %413 = vmatprep.subr.bf16.mxu0 %v427_v6 }
  0x1b   :  { %415 = vmatpush3.bf16.msra.mxu0 %v414_v25 }
  0x1c   :  { %416 = vmatprep.subr.bf16.mxu0 %v427_v6 }
  0x1f   :  { %418 = vmatpush3.bf16.msra.mxu0 %v417_v28 }
  0x20   :  { %419 = vmatprep.subr.bf16.mxu0 %v427_v6 }
  0x23   :  { %421 = vmatpush3.bf16.msra.mxu0 %v420_v31 }
  0xd6   :  { %v106_v32 = vpop.f32.mrb[0].mxu1 }
  0xd7   :  { %v352_v33 = vpop.f32.mrb[1].mxu1 }
  0xdc   :  { %v180_v34 = vpop.f32.mrb[2].mxu1 }
  0xdd   :  { %v181_v36 = vadd.f32 %v180_v34, %v106_v32  ;;  %v359_v37 = vpop.f32.mrb[3].mxu1 }
  0xdf   :  { %v191_v38 = vadd.f32 %v325_v35, %v181_v36 }
  0xe1   :  { %v192_v39 = vmax.f32 %v191_v38, 0.0 }
  0xe3   :  { %393 = vmatmul.mubr.f32.vlgmr.msra.gmra.mrb[0].mxu0 %v192_v39 }
 0x1b6   :  { %v277_v41 = vpop.f32.mrb[0].mxu0 }
 0x1b7   :  { %v278_v42 = vadd.f32 %v277_v41, %v210_v40  ;;  %v394_v43 = vpop.f32.mrb[1].mxu0 }
 0x1b9   :  { %282 = vst.msk [vmem:[#allocation3] sm:$0xff] %vm281_vm4, %v278_v42 }
 0x1c0   :  { %v300_v44 = vld [vmem:[#allocation3] sm:$0x3] }
 0x1c1   :  { %301 = vst [vmem:[%s550_s7] sm:$0x3] %v300_v44 }

</bundles_post_ra>
